<compile_context>
chip_gen: v7x
topology: tpu7x:2x2x1
jax: 0.10.0
libtpu: 0.0.40
codegen_flags: <defaults>
</compile_context>

<pallas_src>
import functools

import jax
import jax.numpy as jnp
from jax.experimental import pallas as pl
from jax.experimental.pallas import tpu as pltpu


def _layernorm_kernel(x_ref, gamma_ref, beta_ref, o_ref, *, eps):
    # x_ref: (1, C, tile_T) ; gamma_ref / beta_ref: (1, C, 1)
    x = x_ref[...].astype(jnp.float32)
    mean = jnp.mean(x, axis=1, keepdims=True)              # reduce over channels (sublanes)
    centered = x - mean
    var = jnp.mean(centered * centered, axis=1, keepdims=True)  # biased, as in F.layer_norm
    inv = jax.lax.rsqrt(var + eps)                          # EUP rsqrt (free slot)
    g = gamma_ref[...].astype(jnp.float32)                  # broadcasts along lanes
    b = beta_ref[...].astype(jnp.float32)
    o_ref[...] = (centered * inv * g + b).astype(o_ref.dtype)


def _pick_tile_t(C, T):
    """Largest lane-dense T tile that keeps ~4 f32 tile-sized buffers <= ~16 MiB."""
    budget_elems = (16 * 1024 * 1024) // (4 * 4)            # elements per tile
    max_t = max(128, (budget_elems // max(C, 1)) // 128 * 128)
    tile_t = min(2048, max_t)
    t_pad128 = ((T + 127) // 128) * 128                     # no need to exceed padded T
    return max(128, min(tile_t, t_pad128))


def layer_norm_channels(x, gamma, beta, eps=1e-5):
    """x: (B, C, T). Normalizes over C at each (b, t). Returns (B, C, T)."""
    B, C, T = x.shape
    tile_t = _pick_tile_t(C, T)
    # TODO(synk): for extremely large C (> ~10k channels) a single (1, C, 128)
    # tile may exceed VMEM; that case needs a two-pass grid reduction over C.

    # Pad T (lane axis) to a multiple of tile_t. Padded columns are independent
    # positions, so they cannot affect real outputs; they are sliced off below.
    t_pad = pl.cdiv(T, tile_t) * tile_t
    x_in = x if t_pad == T else jnp.pad(x, ((0, 0), (0, 0), (0, t_pad - T)))

    gamma3 = gamma.reshape(1, C, 1)
    beta3 = beta.reshape(1, C, 1)

    # VMEM budget: double-buffered in + out tiles (native dtype) plus a few
    # f32 tile-sized temporaries, with headroom; kept <= 48 MiB for v7x.
    itemsize = jnp.dtype(x.dtype).itemsize
    tile_bytes = C * tile_t * itemsize
    vmem_limit = 4 * tile_bytes + 3 * C * tile_t * 4 + (8 << 20)
    vmem_limit = int(min(max(vmem_limit, 16 << 20), 48 << 20))

    grid = (B, t_pad // tile_t)

    out = pl.pallas_call(
        functools.partial(_layernorm_kernel, eps=eps),
        out_shape=jax.ShapeDtypeStruct((B, C, t_pad), x.dtype),
        grid_spec=pltpu.PrefetchScalarGridSpec(
            num_scalar_prefetch=0,
            grid=grid,
            in_specs=[
                pl.BlockSpec((1, C, tile_t), lambda b, t: (b, 0, t)),
                pl.BlockSpec((1, C, 1), lambda b, t: (0, 0, 0)),
                pl.BlockSpec((1, C, 1), lambda b, t: (0, 0, 0)),
            ],
            out_specs=pl.BlockSpec((1, C, tile_t), lambda b, t: (b, 0, t)),
        ),
        compiler_params=pltpu.CompilerParams(
            dimension_semantics=("parallel", "parallel"),
            vmem_limit_bytes=vmem_limit,
        ),
    )(x_in, gamma3, beta3)

    if t_pad != T:
        out = out[:, :, :T]
    return out


def _reference(x, gamma, beta, eps=1e-5):
    # Pure-JAX reference matching the PyTorch module.
    xt = jnp.transpose(x, (0, 2, 1)).astype(jnp.float32)
    mean = jnp.mean(xt, axis=-1, keepdims=True)
    var = jnp.mean((xt - mean) ** 2, axis=-1, keepdims=True)
    y = (xt - mean) / jnp.sqrt(var + eps) * gamma + beta
    return jnp.transpose(y, (0, 2, 1)).astype(x.dtype)


if __name__ == "__main__":
    B, C, T = 2, 32, 16  # batch=2, channels=32, seq=16
    key = jax.random.PRNGKey(0)
    x = jax.random.normal(key, (B, C, T), dtype=jnp.float32)

    # Deterministic parameter init, matching nn.Parameter(torch.ones/zeros(channels)).
    gamma = jnp.ones((C,), dtype=jnp.float32)
    beta = jnp.zeros((C,), dtype=jnp.float32)

    out = layer_norm_channels(x, gamma, beta, eps=1e-5)
    out = jax.block_until_ready(out)

    ref = _reference(x, gamma, beta, eps=1e-5)
    assert out.shape == (B, C, T)
    assert jnp.allclose(out, ref, atol=1e-5, rtol=1e-5), "mismatch vs reference"

    print("KERNEL_OK")
</pallas_src>

<mosaic_0001>
module attributes {stable_mosaic.version = 11 : i64} {
  func.func @_layernorm_kernel(%arg0: i32, %arg1: i32, %arg2: memref<1x32x128xf32, #tpu.memory_space<vmem>>, %arg3: memref<1x32x1xf32, #tpu.memory_space<vmem>>, %arg4: memref<1x32x1xf32, #tpu.memory_space<vmem>>, %arg5: memref<1x32x128xf32, #tpu.memory_space<vmem>>) attributes {dimension_semantics = [#tpu.dimension_semantics<parallel>, #tpu.dimension_semantics<parallel>], iteration_bounds = array<i64: 2, 1>, scalar_prefetch = 0 : i64, scratch_operands = 0 : i64, tpu.core_type = #tpu.core_type<tc>, window_params = [{transform_indices = @transform_0, window_bounds = array<i64: 1, 32, 128>}, {pipeline_mode = #tpu.pipeline_mode<synchronous>, transform_indices = @transform_1, window_bounds = array<i64: 1, 32, 1>}, {pipeline_mode = #tpu.pipeline_mode<synchronous>, transform_indices = @transform_2, window_bounds = array<i64: 1, 32, 1>}, {transform_indices = @transform_3, window_bounds = array<i64: 1, 32, 128>}]} {
    %c0 = arith.constant 0 : index
    %c0_0 = arith.constant 0 : index
    %c0_1 = arith.constant 0 : index
    %0 = vector.load %arg2[%c0, %c0_0, %c0_1] : memref<1x32x128xf32, #tpu.memory_space<vmem>>, vector<1x32x128xf32>
    %cst = arith.constant dense<0.000000e+00> : vector<1x128xf32>
    %1 = vector.multi_reduction <add>, %0, %cst [1] : vector<1x32x128xf32> to vector<1x128xf32>
    %2 = vector.shape_cast %1 : vector<1x128xf32> to vector<1x1x128xf32>
    %cst_2 = arith.constant 3.200000e+01 : f32
    %3 = vector.broadcast %cst_2 : f32 to vector<1x1x128xf32>
    %4 = arith.divf %2, %3 : vector<1x1x128xf32>
    %5 = vector.broadcast %4 : vector<1x1x128xf32> to vector<1x32x128xf32>
    %6 = arith.subf %0, %5 : vector<1x32x128xf32>
    %7 = arith.mulf %6, %6 : vector<1x32x128xf32>
    %cst_3 = arith.constant dense<0.000000e+00> : vector<1x128xf32>
    %8 = vector.multi_reduction <add>, %7, %cst_3 [1] : vector<1x32x128xf32> to vector<1x128xf32>
    %9 = vector.shape_cast %8 : vector<1x128xf32> to vector<1x1x128xf32>
    %cst_4 = arith.constant 3.200000e+01 : f32
    %10 = vector.broadcast %cst_4 : f32 to vector<1x1x128xf32>
    %11 = arith.divf %9, %10 : vector<1x1x128xf32>
    %cst_5 = arith.constant 9.99999974E-6 : f32
    %12 = vector.broadcast %cst_5 : f32 to vector<1x1x128xf32>
    %13 = arith.addf %11, %12 : vector<1x1x128xf32>
    %14 = math.rsqrt %13 : vector<1x1x128xf32>
    %c0_6 = arith.constant 0 : index
    %c0_7 = arith.constant 0 : index
    %c0_8 = arith.constant 0 : index
    %15 = vector.load %arg3[%c0_6, %c0_7, %c0_8] : memref<1x32x1xf32, #tpu.memory_space<vmem>>, vector<1x32x1xf32>
    %c0_9 = arith.constant 0 : index
    %c0_10 = arith.constant 0 : index
    %c0_11 = arith.constant 0 : index
    %16 = vector.load %arg4[%c0_9, %c0_10, %c0_11] : memref<1x32x1xf32, #tpu.memory_space<vmem>>, vector<1x32x1xf32>
    %17 = vector.broadcast %14 : vector<1x1x128xf32> to vector<1x32x128xf32>
    %18 = arith.mulf %6, %17 : vector<1x32x128xf32>
    %19 = vector.broadcast %15 : vector<1x32x1xf32> to vector<1x32x128xf32>
    %20 = arith.mulf %18, %19 : vector<1x32x128xf32>
    %21 = vector.broadcast %16 : vector<1x32x1xf32> to vector<1x32x128xf32>
    %22 = arith.addf %20, %21 : vector<1x32x128xf32>
    %c0_12 = arith.constant 0 : index
    %c0_13 = arith.constant 0 : index
    %c0_14 = arith.constant 0 : index
    %23 = vector.load %arg5[%c0_12, %c0_13, %c0_14] : memref<1x32x128xf32, #tpu.memory_space<vmem>>, vector<1x32x128xf32>
    tpu.vector_store %arg5[%c0_12, %c0_13, %c0_14], %22 {strides = array<i32>} : memref<1x32x128xf32, #tpu.memory_space<vmem>>, vector<1x32x128xf32>,
    return
  }
  func.func @transform_0(%arg0: i32, %arg1: i32) -> (i32, i32, i32) {
    %c0_i32 = arith.constant 0 : i32
    %c0_i32_0 = arith.constant 0 : i32
    return %arg0, %c0_i32, %arg1 : i32, i32, i32
  }
  func.func @transform_1(%arg0: i32, %arg1: i32) -> (i32, i32, i32) {
    %c0_i32 = arith.constant 0 : i32
    %c0_i32_0 = arith.constant 0 : i32
    %c0_i32_1 = arith.constant 0 : i32
    %c0_i32_2 = arith.constant 0 : i32
    return %c0_i32, %c0_i32_0, %c0_i32_1 : i32, i32, i32
  }
  func.func @transform_2(%arg0: i32, %arg1: i32) -> (i32, i32, i32) {
    %c0_i32 = arith.constant 0 : i32
    %c0_i32_0 = arith.constant 0 : i32
    %c0_i32_1 = arith.constant 0 : i32
    %c0_i32_2 = arith.constant 0 : i32
    return %c0_i32, %c0_i32_0, %c0_i32_1 : i32, i32, i32
  }
  func.func @transform_3(%arg0: i32, %arg1: i32) -> (i32, i32, i32) {
    %c0_i32 = arith.constant 0 : i32
    %c0_i32_0 = arith.constant 0 : i32
    return %arg0, %c0_i32, %arg1 : i32, i32, i32
  }
}

</mosaic_0001>

<bundles_post_ra>
// kernel: tpu_custom_call.1
= control target key start
LH: loop header
LB: loop body
LE: loop exit
PB: predicated region body
PF: predicated region fallthrough
CT: control target
= control target key end

     0   :  { %8 = vsyncpa [#allocation3], 0  ;;  %s706_s0 = inlined_call_operand.vmem [shape: f32[2,32,128], index: 0, kind: input, shape index: {}]   ;;  %s707_s1 = inlined_call_operand.vmem [shape: f32[1,32,1], index: 1, kind: input, shape index: {}]   ;;  %s708_s2 = inlined_call_operand.vmem [shape: f32[1,32,1], index: 2, kind: input, shape index: {}]   ;;  %s709_s3 = inlined_call_operand.hbm [shape: f32[2,32,128], index: 3, kind: output, shape index: {}]  }
   0x1   :  { %10 = vsyncpa [#allocation3 + $0x1], 0  ;;  %s567_s12 = smov 0   ;;  %s569_s13 = smov 0  }
   0x2   :  { %s571_s14 = smov 0   ;;  %s573_s15 = smov 0  }
   0x3   :  { %s575_s16 = smov 0   ;;  %s577_s17 = smov 0  }
   0x4 LB: > { %s386_s18 = sadd.s32 4294967295, %s541_s17   ;;  %s387_s19 = sadd.s32 4294967294, %s541_s17   ;;  %s541_s17 = sphi %s577_s17, %s16_s17   ;;  %s537_s16 = sphi %s575_s16, %s716_s16   ;;  %s533_s15 = sphi %s573_s15, %s715_s15   ;;  %s529_s14 = sphi %s571_s14, %s714_s14   ;;  %s525_s13 = sphi %s569_s13, %s713_s13   ;;  %s521_s12 = sphi %s567_s12, %s712_s12  }
   0x5   : > { %s28_s20 = sadd.s32 1, %s537_s16  ;;  %s107_s21 = sadd.s32 1, %s529_s14 }
   0x6   : > { %p30_p0 = scmp.ge.s32.totalorder %s28_s20, 2  ;;  %p117_p1 = scmp.ne.s32.totalorder %s529_s14, %s525_s13 }
   0x7   : > { %p118_p2 = scmp.eq.s32.totalorder %s386_s18, 1  ;;  %p123_p3 = scmp.ne.s32.totalorder %s525_s13, %s521_s12 }
   0x8   : > { %s718_s20 = smov (%p30_p0, %s28_s20), 0  ;;  %p124_p5 = scmp.eq.s32.totalorder %s387_s19, 1 }
   0x9   : > { %p607_p4 = por %p118_p2, %p117_p1  ;;  %s102_s23 = ssub.s32 %s537_s16, %s718_s20 }
   0xa   : > { %p390_p6 = scmp.ge.s32.totalorder %s541_s17, 1  ;;  %p105_p7 = scmp.eq.s32.totalorder %s102_s23, 0 }
   0xb   : > { %p614_p8 = por %p124_p5, %p123_p3  ;;  %p159_p9 = scmp.lt.s32.totalorder %s541_s17, 3 }
   0xc   : > { %s620_s25 = scalar_select %p105_p7, %s529_s14, %s107_s21  }
   0xd   : > { %p160_p10 = pnand %p390_p6, %p159_p9 }
   0xe   : > { %v231_v0 = vld [vmem:[%s707_s1 + $0x10] sm:$0xff] (!%p160_p10)  ;;  %v229_v1 = vld [vmem:[%s707_s1] sm:$0xff] (!%p160_p10)  ;;  %v543_v2 = vmov (!%p160_p10), 0   ;;  %v232_v3 = vld [vmem:[%s707_s1 + $0x18] sm:$0xff] (!%p160_p10)  ;;  %p186_p11 = scmp.lt.s32.totalorder (!%p160_p10), %s533_s15, 1  ;;  %s183_s30 = sand.u32 (!%p160_p10), 1, %s525_s13  }
   0xf   : > { %163 = sbr.rel (%p160_p10) target bundleno = 173 (0xad), region = 32  ;;  %460 = vset.pattern.permute.xlu1 (!%p160_p10), %v543_v2  ;;  %459 = vset.pattern.permute.xlu0 (!%p160_p10), %v543_v2  ;;  %v230_v4 = vld [vmem:[%s707_s1 + $0x8] sm:$0xff] (!%p160_p10)  ;;  %v233_v6 = vld [vmem:[%s708_s2] sm:$0xff] (!%p160_p10)  ;;  %v236_v7 = vld [vmem:[%s708_s2 + $0x18] sm:$0xff] (!%p160_p10)  ;;  %s391_s4 = sshll.u32 (!%p160_p10), %s183_s30, 5 }
  0x10   : > { %253 = vperm.xlu1 (!%p160_p10), %460, %v231_v0   ;;  %243 = vperm.xlu0 (!%p160_p10), %459, %v229_v1   ;;  %v234_v5 = vld [vmem:[%s708_s2 + $0x8] sm:$0xff] (!%p160_p10)  ;;  %v235_v8 = vld [vmem:[%s708_s2 + $0x10] sm:$0xff] (!%p160_p10)  ;;  %s185_s5 = scalar_lea.vmem (!%p160_p10), [#allocation2], %s391_s4  ;;  %s400_s7 = sshll.u32 (!%p160_p10), %s533_s15, 9 }
  0x11   : > { %s308_s6 = sshll.u32 (!%p160_p10), %s185_s5, 4  ;;  %s658_s10 = scalar_lea.hbm (!%p160_p10), %s709_s3, %s400_s7  ;;  %s653_s6 = int_to_ptr.vmem [resolvable:$true] %s308_s6 }
  0x12   : > { %s463_s11 = scalar_lea.vmem (!%p160_p10), %s653_s6, 512  ;;  %s544_s18 = smov (!%p160_p10), [#allocation2]  }
  0x13   : > { %p464_p12 = scmp.ne.s32.totalorder (!%p160_p10), %s653_s6, %s463_s11  ;;  %s467_s19 = sshll.u32 (!%p160_p10), %s544_s18, 4  ;;  %s468_s19 = int_to_ptr.vmem [resolvable:$false] %s467_s19 }
  0x14   : > { %258 = vperm.xlu1 (!%p160_p10), %460, %v232_v3   ;;  %248 = vperm.xlu0 (!%p160_p10), %459, %v230_v4   ;;  %s469_s21 = scalar_lea.vmem (!%p160_p10), %s468_s19, 1024  ;;  %p470_p1 = scmp.lt.s32.totalorder (!%p160_p10), %s653_s6, %s468_s19 }
  0x15   : > { %p465_p13 = pnand (!%p160_p10), %p464_p12, %p607_p4  ;;  %p471_p2 = scmp.lt.s32.totalorder (!%p160_p10), %s469_s21, %s463_s11 }
  0x16   : > { %s187_s23 = scalar_select %p186_p11, %s533_s15, 1 }
  0x17   : > { %s660_s15 = scalar_lea.sflag [#allocation3], %s183_s30  ;;  %p466_p0 = pneg %p465_p13 }
  0x18   : > { %272 = vperm.xlu1 %460, %v234_v5   ;;  %267 = vperm.xlu0 %459, %v233_v6   ;;  %s399_s26 = sshll.u32 %s187_s23, 5  ;;  %p472_p3 = por %p471_p2, %p470_p1 }
  0x19   : > { %s193_s29 = scalar_lea.vmem %s706_s0, %s399_s26 }
  0x1a   : > { %v194_v9 = vld [vmem:[%s193_s29] sm:$0xff]  ;;  %v195_v10 = vld [vmem:[%s193_s29 + $0x8] sm:$0xff]  ;;  %v196_v12 = vld [vmem:[%s193_s29 + $0x10] sm:$0xff]  ;;  %p473_p5 = pnand %p472_p3, %p466_p0 }
  0x1b   : > { %v198_v11 = vadd.f32 %v195_v10, %v194_v9  ;;  %v197_v14 = vld [vmem:[%s193_s29 + $0x18] sm:$0xff] }
  0x1c   : > { %282 = vperm.xlu1 %460, %v236_v7   ;;  %277 = vperm.xlu0 %459, %v235_v8  }
  0x1d   : > { %v199_v13 = vadd.f32 %v198_v11, %v196_v12 }
  0x1f   : > { %v200_v15 = vadd.f32 %v199_v13, %v197_v14 }
  0x21   : > { %v201_v16 = vrot.slane %v200_v15, 4 }
  0x23   : > { %v202_v17 = vadd.f32 %v201_v16, %v200_v15 }
  0x25   : > { %v203_v18 = vrot.slane %v202_v17, 2 }
  0x27   : > { %v204_v19 = vadd.f32 %v203_v18, %v202_v17 }
  0x29   : > { %v205_v20 = vrot.slane %v204_v19, 1 }
  0x2b   : > { %v206_v21 = vadd.f32 %v205_v20, %v204_v19 }
  0x2d   : > { %v208_v22 = vmul.f32 0.03125, %v206_v21 }
  0x2f   : > { %v209_v23 = vsub.f32 %v194_v9, %v208_v22  ;;  %v210_v24 = vsub.f32 %v195_v10, %v208_v22  ;;  %v211_v25 = vsub.f32 %v196_v12, %v208_v22  ;;  %v212_v28 = vsub.f32 %v197_v14, %v208_v22 }
  0x31   : > { %v213_v26 = vmul.f32 %v209_v23, %v209_v23  ;;  %v214_v27 = vmul.f32 %v210_v24, %v210_v24  ;;  %v215_v29 = vmul.f32 %v211_v25, %v211_v25  ;;  %v216_v31 = vmul.f32 %v212_v28, %v212_v28 }
  0x33   : > { %v217_v30 = vadd.f32 %v214_v27, %v213_v26 }
  0x35   : > { %v218_v32 = vadd.f32 %v217_v30, %v215_v29 }
  0x37   : > { %v219_v33 = vadd.f32 %v218_v32, %v216_v31 }
  0x39   : > { %v220_v34 = vrot.slane %v219_v33, 4 }
  0x3b   : > { %v221_v35 = vadd.f32 %v220_v34, %v219_v33 }
  0x3d   : > { %v222_v36 = vrot.slane %v221_v35, 2 }
  0x3f   : > { %v223_v37 = vadd.f32 %v222_v36, %v221_v35 }
  0x41   : > { %v224_v38 = vrot.slane %v223_v37, 1 }
  0x43   : > { %v225_v39 = vadd.f32 %v224_v38, %v223_v37 }
  0x45   : > { %v226_v40 = vmul.f32 0.03125, %v225_v39 }
  0x47   : > { %v227_v41 = vadd.f32 1e-05, %v226_v40 }
  0x49   : > { %461 = vrsqrt.f32 %v227_v41 }
  0x53   : > { %v462_v42 = vpop.eup %461 }
  0x54   : > { %v237_v45 = vmul.f32 %v462_v42, %v209_v23  ;;  %v238_v46 = vmul.f32 %v462_v42, %v210_v24  ;;  %v239_v49 = vmul.f32 %v462_v42, %v211_v25  ;;  %v240_v51 = vmul.f32 %v462_v42, %v212_v28 }
  0x8f   : > { %v254_v43 = vpop.permute.xlu1 %253  ;;  %v244_v44 = vpop.permute.xlu0 %243 }
  0x90   : > { %v261_v50 = vmul.f32 %v244_v44, %v237_v45  ;;  %v263_v57 = vmul.f32 %v254_v43, %v239_v49 }
  0x93   : > { %v259_v47 = vpop.permute.xlu1 %258  ;;  %v249_v48 = vpop.permute.xlu0 %248 }
  0x94   : > { %v262_v52 = vmul.f32 %v249_v48, %v238_v46  ;;  %v264_v58 = vmul.f32 %v259_v47, %v240_v51 }
  0x97   : > { %v273_v53 = vpop.permute.xlu1 %272  ;;  %v268_v54 = vpop.permute.xlu0 %267 }
  0x98   : > { %v286_v55 = vadd.f32 %v273_v53, %v262_v52  ;;  %v285_v56 = vadd.f32 %v268_v54, %v261_v50 }
  0x9a   : > { %290 = vst [vmem:[%s185_s5 + $0x8] sm:$0xff] %v286_v55  ;;  %289 = vst [vmem:[%s185_s5] sm:$0xff] %v285_v56 }
  0x9b   : > { %v283_v59 = vpop.permute.xlu1 %282  ;;  %v278_v60 = vpop.permute.xlu0 %277 }
  0x9c   : > { %v288_v61 = vadd.f32 %v283_v59, %v264_v58  ;;  %v287_v62 = vadd.f32 %v278_v60, %v263_v57 }
  0x9e   : > { %292 = vst [vmem:[%s185_s5 + $0x18] sm:$0xff] %v288_v61  ;;  %291 = vst [vmem:[%s185_s5 + $0x10] sm:$0xff] %v287_v62 }
  0x9f   : > { %476 = shalt.err (!%p473_p5)
}
  0xa0   : > { %s477_s23 = scalar_lea.hbm %s658_s10, 512  ;;  %s481_s28 = scalar_lea.hbm %s709_s3, 1024 }
  0xa1   : > { %p478_p6 = scmp.ne.s32.totalorder %s658_s10, %s477_s23  ;;  %p482_p10 = scmp.lt.u32.totalorder %s658_s10, %s709_s3 }
  0xa2   : > { %p483_p11 = scmp.lt.u32.totalorder %s481_s28, %s477_s23  ;;  %p485_p13 = scmp.lt.u32.totalorder %s477_s23, %s658_s10 }
  0xa3   : > { %p479_p7 = pnand %p478_p6, %p607_p4 }
  0xa4   : > { %p484_p12 = por %p483_p11, %p482_p10 }
  0xa5   : > { %p480_p9 = pneg %p479_p7 }
  0xa6   : > { %p486_p0 = por %p485_p13, %p484_p12 }
  0xa8   : > { %p487_p1 = pnand %p486_p0, %p480_p9 }
  0xaa   : > { %490 = shalt.err (!%p487_p1)
}
  0xab   : > { %s545_s4 = smov 128   ;;  %s546_s5 = smov 8  }
  0xac   : > { %401 = dma.vmem_to_hbm [thread:$0]  (%p607_p4), %s653_s6, 512, %s658_s10, %s660_s15, %s545_s4, %s545_s4, %s546_s5  }
  0xad PF: > { %p407_p2 = scmp.ge.s32.totalorder %s541_s17, 2  ;;  %s323_s7 = sand.u32 1, %s521_s12  }
  0xae   : > { %s324_s8 = scalar_lea.sflag [#allocation3], %s323_s7 }
  0xaf   : > { %p404_p3 = pnand %p407_p2, %p614_p8 }
  0xb1   : > { %516 = dma.done.wait (!%p404_p3), %s324_s8, 512  }
  0xb2   : > { %518 = vsyncadd (!%p404_p3), %s324_s8, 4294966784  ;;  %s16_s17 = sadd.s32 1, %s541_s17   ;;  %s712_s12 = smov %s525_s13 }
  0xb3   : > { %p13_p5 = scmp.ge.s32.totalorder %s16_s17, 4   ;;  %s713_s13 = smov %s529_s14 }
  0xb4   : > { %s714_s14 = smov %s620_s25  ;;  %s715_s15 = smov %s537_s16 }
  0xb5   : > { %s716_s16 = smov %s718_s20  ;;  %15 = sbr.rel (!%p13_p5) target bundleno = 4 (0x4), region = 67 }
  0xbc   :  { %329 = vsyncpa [#allocation3], 1 }
  0xbd   :  { %331 = vsyncpa [#allocation3 + $0x1], 1 }

</bundles_post_ra>
